<compile_context>
chip_gen: v5e
topology: v5e:2x2
jax: 0.10.0
libtpu: 0.0.40
codegen_flags: <defaults>
</compile_context>

<pallas_src>
import numpy as np
import jax
import jax.numpy as jnp
from jax.experimental import pallas as pl
from jax.experimental.pallas import tpu as pltpu

K = 15
LANE = 128


def _round_up(a: int, b: int) -> int:
    return (a + b - 1) // b * b


def _diamond_weight(k: int = K) -> np.ndarray:
    """Deterministic parameter init — identical to the module's __init__."""
    w = np.zeros((k, k), dtype=np.float32)
    t = (k - 1) / 2
    for i in range(k):
        for j in range(k):
            if abs(i - t) + abs(j - t) <= t:
                w[i, j] = 1.0
    return w


def _make_inflation_kernel(th: int, halo: int, win: int, wout: int, k: int):
    """Row-tiled diamond convolution with the 0/1 weight baked at trace time.

    Refs:
      main_ref : (th,   win)  rows [i*th, (i+1)*th) of the padded image
      halo_ref : (halo, win)  rows [(i+1)*th, (i+1)*th + halo)
      o_ref    : (th,  wout)  output rows [i*th, (i+1)*th), lane-dense
      xbuf     : (th+halo, win) VMEM scratch holding the haloed slab
    """
    c = k // 2

    def kernel(main_ref, halo_ref, o_ref, xbuf):
        # Assemble the haloed input slab (contiguous rows) in VMEM scratch.
        xbuf[0:th, :] = main_ref[...]
        xbuf[th:th + halo, :] = halo_ref[...]
        x = xbuf[...]

        # s = B_w: horizontal box sums of (odd) width w, built incrementally.
        s = x                      # B_1
        acc = None
        for w in range(1, k + 1, 2):
            d = (k - w) // 2       # column offset of the width-w run
            i_top = c - d          # the two row offsets that use width w
            i_bot = c + d
            contrib = s[i_top:i_top + th, d:d + wout]
            acc = contrib if acc is None else acc + contrib
            if i_bot != i_top:
                acc = acc + s[i_bot:i_bot + th, d:d + wout]
            if w < k:
                # Widen the box sums: B_w -> B_{w+2} (2 adds, valid width -2).
                cn = s.shape[1] - 2
                s = x[:, 0:cn] + s[:, 1:1 + cn] + x[:, w + 1:w + 1 + cn]
        o_ref[...] = acc

    return kernel


def inflation_forward(x: jax.Array, k: int = K, tile_h: int | None = None) -> jax.Array:
    """Equivalent of inflation(K=k).forward(x) for a 2D input map x."""
    assert k % 2 == 1 and k >= 3
    pad = k // 2
    H, W = x.shape
    x = x.astype(jnp.float32)

    halo = _round_up(k - 1, 16)                 # 16 rows for K=15 (>= k-1, sublane aligned)
    if tile_h is None:
        tile_h = min(128, _round_up(H, halo))   # row-tile height (multiple of halo)
    assert tile_h % halo == 0 and tile_h >= 8

    wout = _round_up(max(W, 1), LANE)           # lane-dense output width
    win = wout + LANE                           # input width incl. 14-col halo, lane aligned
    n_tiles = -(-H // tile_h)
    hp = n_tiles * tile_h + halo                # padded input rows (covers bottom halo)

    # Single zero-pad: provides the conv halo + lane/tile alignment in one shot.
    xpad = jnp.pad(x, ((pad, hp - H - pad), (pad, win - W - pad)))

    kernel = _make_inflation_kernel(tile_h, halo, win, wout, k)
    out = pl.pallas_call(
        kernel,
        out_shape=jax.ShapeDtypeStruct((n_tiles * tile_h, wout), jnp.float32),
        grid=(n_tiles,),
        in_specs=[
            # main rows of tile i: [i*tile_h, (i+1)*tile_h)
            pl.BlockSpec((tile_h, win), lambda i: (i, 0)),
            # halo rows of tile i: [(i+1)*tile_h, (i+1)*tile_h + halo)
            pl.BlockSpec((halo, win), lambda i: ((i + 1) * (tile_h // halo), 0)),
        ],
        out_specs=pl.BlockSpec((tile_h, wout), lambda i: (i, 0)),
        scratch_shapes=[pltpu.VMEM((tile_h + halo, win), jnp.float32)],
        compiler_params=pltpu.CompilerParams(
            dimension_semantics=("parallel",)),
    )(xpad, xpad)
    return out[:H, :W]


def _reference(x: jax.Array, k: int = K) -> jax.Array:
    """XLA conv reference (same semantics as the torch Conv2d in the module)."""
    w = jnp.asarray(_diamond_weight(k))
    return jax.lax.conv_general_dilated(
        x[None, None, :, :].astype(jnp.float32),
        w[None, None, :, :],
        window_strides=(1, 1),
        padding=((k // 2, k // 2), (k // 2, k // 2)),
        dimension_numbers=("NCHW", "OIHW", "NCHW"),
    )[0, 0]


if __name__ == "__main__":
    key = jax.random.PRNGKey(0)
    k1, k2 = jax.random.split(key)

    # Case 1: small square map (single tile).
    H = W = 16
    x = jax.random.uniform(k1, (H, W), dtype=jnp.float32)
    y = jax.block_until_ready(inflation_forward(x))
    ref = jax.block_until_ready(_reference(x))
    assert y.shape == (H, W), y.shape
    np.testing.assert_allclose(np.asarray(y), np.asarray(ref), rtol=1e-5, atol=1e-4)

    # Case 2: non-aligned map with a forced small row tile -> exercises the
    # multi-tile grid and the cross-tile halo path (3 row tiles).
    H2, W2 = 40, 33
    x2 = jax.random.uniform(k2, (H2, W2), dtype=jnp.float32)
    y2 = jax.block_until_ready(inflation_forward(x2, tile_h=16))
    ref2 = jax.block_until_ready(_reference(x2))
    assert y2.shape == (H2, W2), y2.shape
    np.testing.assert_allclose(np.asarray(y2), np.asarray(ref2), rtol=1e-5, atol=1e-4)

    print("KERNEL_OK")
</pallas_src>

<mosaic_0001>
module attributes {stable_mosaic.version = 11 : i64} {
  func.func @kernel(%arg0: i32, %arg1: memref<16x256xf32, #tpu.memory_space<vmem>>, %arg2: memref<16x256xf32, #tpu.memory_space<vmem>>, %arg3: memref<16x128xf32, #tpu.memory_space<vmem>>, %arg4: memref<32x256xf32, #tpu.memory_space<vmem>>) attributes {dimension_semantics = [#tpu.dimension_semantics<parallel>], iteration_bounds = array<i64: 1>, scalar_prefetch = 0 : i64, scratch_operands = 1 : i64, tpu.core_type = #tpu.core_type<tc>, window_params = [{transform_indices = @transform_0, window_bounds = array<i64: 16, 256>}, {transform_indices = @transform_1, window_bounds = array<i64: 16, 256>}, {transform_indices = @transform_2, window_bounds = array<i64: 16, 128>}]} {
    %c0 = arith.constant 0 : index
    %c0_0 = arith.constant 0 : index
    %0 = vector.load %arg1[%c0, %c0_0] : memref<16x256xf32, #tpu.memory_space<vmem>>, vector<16x256xf32>
    %c0_1 = arith.constant 0 : index
    %c0_2 = arith.constant 0 : index
    %1 = vector.load %arg4[%c0_1, %c0_2] : memref<32x256xf32, #tpu.memory_space<vmem>>, vector<16x256xf32>
    tpu.vector_store %arg4[%c0_1, %c0_2], %0 {strides = array<i32>} : memref<32x256xf32, #tpu.memory_space<vmem>>, vector<16x256xf32>,
    %c0_3 = arith.constant 0 : index
    %c0_4 = arith.constant 0 : index
    %2 = vector.load %arg2[%c0_3, %c0_4] : memref<16x256xf32, #tpu.memory_space<vmem>>, vector<16x256xf32>
    %c16 = arith.constant 16 : index
    %c0_5 = arith.constant 0 : index
    %3 = vector.load %arg4[%c16, %c0_5] : memref<32x256xf32, #tpu.memory_space<vmem>>, vector<16x256xf32>
    tpu.vector_store %arg4[%c16, %c0_5], %2 {strides = array<i32>} : memref<32x256xf32, #tpu.memory_space<vmem>>, vector<16x256xf32>,
    %c0_6 = arith.constant 0 : index
    %c0_7 = arith.constant 0 : index
    %4 = vector.load %arg4[%c0_6, %c0_7] : memref<32x256xf32, #tpu.memory_space<vmem>>, vector<32x256xf32>
    %5 = vector.extract_strided_slice %4 {offsets = [0, 7], sizes = [16, 128], strides = [1, 1]} : vector<32x256xf32> to vector<16x128xf32>
    %6 = vector.extract_strided_slice %4 {offsets = [14, 7], sizes = [16, 128], strides = [1, 1]} : vector<32x256xf32> to vector<16x128xf32>
    %7 = arith.addf %5, %6 : vector<16x128xf32>
    %8 = vector.extract_strided_slice %4 {offsets = [0, 0], sizes = [32, 254], strides = [1, 1]} : vector<32x256xf32> to vector<32x254xf32>
    %9 = vector.extract_strided_slice %4 {offsets = [0, 1], sizes = [32, 254], strides = [1, 1]} : vector<32x256xf32> to vector<32x254xf32>
    %10 = arith.addf %8, %9 : vector<32x254xf32>
    %11 = vector.extract_strided_slice %4 {offsets = [0, 2], sizes = [32, 254], strides = [1, 1]} : vector<32x256xf32> to vector<32x254xf32>
    %12 = arith.addf %10, %11 : vector<32x254xf32>
    %13 = vector.extract_strided_slice %12 {offsets = [1, 6], sizes = [16, 128], strides = [1, 1]} : vector<32x254xf32> to vector<16x128xf32>
    %14 = arith.addf %7, %13 : vector<16x128xf32>
    %15 = vector.extract_strided_slice %12 {offsets = [13, 6], sizes = [16, 128], strides = [1, 1]} : vector<32x254xf32> to vector<16x128xf32>
    %16 = arith.addf %14, %15 : vector<16x128xf32>
    %17 = vector.extract_strided_slice %4 {offsets = [0, 0], sizes = [32, 252], strides = [1, 1]} : vector<32x256xf32> to vector<32x252xf32>
    %18 = vector.extract_strided_slice %12 {offsets = [0, 1], sizes = [32, 252], strides = [1, 1]} : vector<32x254xf32> to vector<32x252xf32>
    %19 = arith.addf %17, %18 : vector<32x252xf32>
    %20 = vector.extract_strided_slice %4 {offsets = [0, 4], sizes = [32, 252], strides = [1, 1]} : vector<32x256xf32> to vector<32x252xf32>
    %21 = arith.addf %19, %20 : vector<32x252xf32>
    %22 = vector.extract_strided_slice %21 {offsets = [2, 5], sizes = [16, 128], strides = [1, 1]} : vector<32x252xf32> to vector<16x128xf32>
    %23 = arith.addf %16, %22 : vector<16x128xf32>
    %24 = vector.extract_strided_slice %21 {offsets = [12, 5], sizes = [16, 128], strides = [1, 1]} : vector<32x252xf32> to vector<16x128xf32>
    %25 = arith.addf %23, %24 : vector<16x128xf32>
    %26 = vector.extract_strided_slice %4 {offsets = [0, 0], sizes = [32, 250], strides = [1, 1]} : vector<32x256xf32> to vector<32x250xf32>
    %27 = vector.extract_strided_slice %21 {offsets = [0, 1], sizes = [32, 250], strides = [1, 1]} : vector<32x252xf32> to vector<32x250xf32>
    %28 = arith.addf %26, %27 : vector<32x250xf32>
    %29 = vector.extract_strided_slice %4 {offsets = [0, 6], sizes = [32, 250], strides = [1, 1]} : vector<32x256xf32> to vector<32x250xf32>
    %30 = arith.addf %28, %29 : vector<32x250xf32>
    %31 = vector.extract_strided_slice %30 {offsets = [3, 4], sizes = [16, 128], strides = [1, 1]} : vector<32x250xf32> to vector<16x128xf32>
    %32 = arith.addf %25, %31 : vector<16x128xf32>
    %33 = vector.extract_strided_slice %30 {offsets = [11, 4], sizes = [16, 128], strides = [1, 1]} : vector<32x250xf32> to vector<16x128xf32>
    %34 = arith.addf %32, %33 : vector<16x128xf32>
    %35 = vector.extract_strided_slice %4 {offsets = [0, 0], sizes = [32, 248], strides = [1, 1]} : vector<32x256xf32> to vector<32x248xf32>
    %36 = vector.extract_strided_slice %30 {offsets = [0, 1], sizes = [32, 248], strides = [1, 1]} : vector<32x250xf32> to vector<32x248xf32>
    %37 = arith.addf %35, %36 : vector<32x248xf32>
    %38 = vector.extract_strided_slice %4 {offsets = [0, 8], sizes = [32, 248], strides = [1, 1]} : vector<32x256xf32> to vector<32x248xf32>
    %39 = arith.addf %37, %38 : vector<32x248xf32>
    %40 = vector.extract_strided_slice %39 {offsets = [4, 3], sizes = [16, 128], strides = [1, 1]} : vector<32x248xf32> to vector<16x128xf32>
    %41 = arith.addf %34, %40 : vector<16x128xf32>
    %42 = vector.extract_strided_slice %39 {offsets = [10, 3], sizes = [16, 128], strides = [1, 1]} : vector<32x248xf32> to vector<16x128xf32>
    %43 = arith.addf %41, %42 : vector<16x128xf32>
    %44 = vector.extract_strided_slice %4 {offsets = [0, 0], sizes = [32, 246], strides = [1, 1]} : vector<32x256xf32> to vector<32x246xf32>
    %45 = vector.extract_strided_slice %39 {offsets = [0, 1], sizes = [32, 246], strides = [1, 1]} : vector<32x248xf32> to vector<32x246xf32>
    %46 = arith.addf %44, %45 : vector<32x246xf32>
    %47 = vector.extract_strided_slice %4 {offsets = [0, 10], sizes = [32, 246], strides = [1, 1]} : vector<32x256xf32> to vector<32x246xf32>
    %48 = arith.addf %46, %47 : vector<32x246xf32>
    %49 = vector.extract_strided_slice %48 {offsets = [5, 2], sizes = [16, 128], strides = [1, 1]} : vector<32x246xf32> to vector<16x128xf32>
    %50 = arith.addf %43, %49 : vector<16x128xf32>
    %51 = vector.extract_strided_slice %48 {offsets = [9, 2], sizes = [16, 128], strides = [1, 1]} : vector<32x246xf32> to vector<16x128xf32>
    %52 = arith.addf %50, %51 : vector<16x128xf32>
    %53 = vector.extract_strided_slice %4 {offsets = [0, 0], sizes = [32, 244], strides = [1, 1]} : vector<32x256xf32> to vector<32x244xf32>
    %54 = vector.extract_strided_slice %48 {offsets = [0, 1], sizes = [32, 244], strides = [1, 1]} : vector<32x246xf32> to vector<32x244xf32>
    %55 = arith.addf %53, %54 : vector<32x244xf32>
    %56 = vector.extract_strided_slice %4 {offsets = [0, 12], sizes = [32, 244], strides = [1, 1]} : vector<32x256xf32> to vector<32x244xf32>
    %57 = arith.addf %55, %56 : vector<32x244xf32>
    %58 = vector.extract_strided_slice %57 {offsets = [6, 1], sizes = [16, 128], strides = [1, 1]} : vector<32x244xf32> to vector<16x128xf32>
    %59 = arith.addf %52, %58 : vector<16x128xf32>
    %60 = vector.extract_strided_slice %57 {offsets = [8, 1], sizes = [16, 128], strides = [1, 1]} : vector<32x244xf32> to vector<16x128xf32>
    %61 = arith.addf %59, %60 : vector<16x128xf32>
    %62 = vector.extract_strided_slice %4 {offsets = [0, 0], sizes = [32, 242], strides = [1, 1]} : vector<32x256xf32> to vector<32x242xf32>
    %63 = vector.extract_strided_slice %57 {offsets = [0, 1], sizes = [32, 242], strides = [1, 1]} : vector<32x244xf32> to vector<32x242xf32>
    %64 = arith.addf %62, %63 : vector<32x242xf32>
    %65 = vector.extract_strided_slice %4 {offsets = [0, 14], sizes = [32, 242], strides = [1, 1]} : vector<32x256xf32> to vector<32x242xf32>
    %66 = arith.addf %64, %65 : vector<32x242xf32>
    %67 = vector.extract_strided_slice %66 {offsets = [7, 0], sizes = [16, 128], strides = [1, 1]} : vector<32x242xf32> to vector<16x128xf32>
    %68 = arith.addf %61, %67 : vector<16x128xf32>
    %c0_8 = arith.constant 0 : index
    %c0_9 = arith.constant 0 : index
    %69 = vector.load %arg3[%c0_8, %c0_9] : memref<16x128xf32, #tpu.memory_space<vmem>>, vector<16x128xf32>
    tpu.vector_store %arg3[%c0_8, %c0_9], %68 {strides = array<i32>} : memref<16x128xf32, #tpu.memory_space<vmem>>, vector<16x128xf32>,
    return
  }
  func.func @transform_0(%arg0: i32) -> (i32, i32) {
    %c0_i32 = arith.constant 0 : i32
    %c0_i32_0 = arith.constant 0 : i32
    return %arg0, %c0_i32 : i32, i32
  }
  func.func @transform_1(%arg0: i32) -> (i32, i32) {
    %c1_i32 = arith.constant 1 : i32
    %0 = arith.addi %arg0, %c1_i32 : i32
    %c1_i32_0 = arith.constant 1 : i32
    %1 = arith.muli %0, %c1_i32_0 : i32
    %c0_i32 = arith.constant 0 : i32
    %c0_i32_1 = arith.constant 0 : i32
    return %1, %c0_i32 : i32, i32
  }
  func.func @transform_2(%arg0: i32) -> (i32, i32) {
    %c0_i32 = arith.constant 0 : i32
    %c0_i32_0 = arith.constant 0 : i32
    return %arg0, %c0_i32 : i32, i32
  }
}

</mosaic_0001>

<bundles_post_ra>
// kernel: tpu_custom_call.1
= control target key start
LH: loop header
LB: loop body
LE: loop exit
PB: predicated region body
PF: predicated region fallthrough
CT: control target
= control target key end

     0   :  { %7 = vsyncpa [#allocation4], 0  ;;  %s1827_s0 = inlined_call_operand.hbm [shape: f32[32,256], index: 0, kind: input, shape index: {}]   ;;  %s1828_s1 = inlined_call_operand.hbm [shape: f32[32,256], index: 1, kind: input, shape index: {}]   ;;  %s1829_s2 = inlined_call_operand.hbm [shape: f32[16,128], index: 2, kind: output, shape index: {}]  }
   0x1   :  { %8 = vsyncpa [#allocation7], 0 }
   0x2   :  { %9 = vsyncpa [#allocation5], 0  ;;  %s14_s11 = sshll.u32 %s1827_s0, 4  ;;  %s1104_s12 = smov [#allocation3]   ;;  %s15_s11 = int_to_ptr.hbm [resolvable:$true] %s14_s11 }
   0x3   :  { %s16_s13 = sshll.u32 %s1104_s12, 4  ;;  %s994_s16 = scalar_lea.hbm %s1828_s1, 32  ;;  %s17_s13 = int_to_ptr.vmem [resolvable:$true] %s16_s13 }
   0x4   :  { %s1105_s17 = smov 256   ;;  %s1106_s18 = smov 16  }
   0x5   :  { %22 = dma.hbm_to_vmem [thread:$0]  %s15_s11, 512, %s17_s13, [#allocation4], %s1105_s17, %s1105_s17, %s1106_s18  }
   0x6   :  { %s32_s19 = sshll.u32 %s994_s16, 4  ;;  %s1107_s20 = smov [#allocation6]   ;;  %s33_s19 = int_to_ptr.hbm [resolvable:$true] %s32_s19 }
   0x7   :  { %s34_s21 = sshll.u32 %s1107_s20, 4  ;;  %s35_s21 = int_to_ptr.vmem [resolvable:$true] %s34_s21 }
   0x8   :  { %40 = dma.hbm_to_vmem [thread:$0]  %s33_s19, 512, %s35_s21, [#allocation7], %s1105_s17, %s1105_s17, %s1106_s18  }
   0x9   :  { %1098 = dma.done.wait [#allocation4], 512  }
   0xa   :  { %1099 = vsyncadd [#allocation4], 4294966784 }
   0xb   :  { %1100 = dma.done.wait [#allocation7], 512  }
   0xc   :  { %1101 = vsyncadd [#allocation7], 4294966784  ;;  %v1148_v0 = vld [vmem:[#allocation3 + $0x10] sm:$0xff]  ;;  %v1150_v1 = vld [vmem:[#allocation3] sm:$0xff]  ;;  %s1108_s0 = smov 127   ;;  %s1109_s1 = smov 126  }
   0xd   :  { %106 = vrot.lane.b32.xlu1 %v1148_v0, %s1108_s0  ;;  %102 = vrot.lane.b32.xlu0 %v1150_v1, %s1108_s0  ;;  %v1156_v2 = vld [vmem:[#allocation6] sm:$0xff]  ;;  %v1160_v3 = vld [vmem:[#allocation3 + $0x18] sm:$0xff]  ;;  %v1162_v4 = vld [vmem:[#allocation3 + $0x8] sm:$0xff]  ;;  %s1110_s22 = smov 124   ;;  %s1111_s23 = smov 122   ;;  %vm118_vm0 = vcmask 1039360  }
   0xe   :  { %110 = vrot.lane.b32.xlu2 %v1156_v2, %s1108_s0  ;;  %v1164_v5 = vld [vmem:[#allocation6 + $0x8] sm:$0xff]  ;;  %v1172_v6 = vld [vmem:[#allocation6 + $0x18] sm:$0xff]  ;;  %v1174_v7 = vld [vmem:[#allocation6 + $0x10] sm:$0xff]  ;;  %vm155_vm1 = vcmask 1031168   ;;  %vm295_vm2 = vcmask 1014784   ;;  %vm182_vm3 = vcmask 1046528  }
   0xf   :  { %vm214_vm4 = vcmask 1042432   ;;  %s1112_s24 = smov 1   ;;  %s1113_s25 = smov 120   ;;  %vm322_vm5 = vcmask 1045504   ;;  %vm354_vm6 = vcmask 1043456   ;;  %vm201_vm7 = vcmask 7168  }
  0x10   :  { %s1114_s26 = smov 118   ;;  %s1115_s27 = smov 2   ;;  %vm81_vm8 = vcmask 1041408   ;;  %vm435_vm9 = vcmask 998400   ;;  %vm462_vm10 = vcmask 1044480   ;;  %vm341_vm11 = vcmask 15360  }
  0x11   :  { %s1116_s28 = smov 3   ;;  %s1117_s29 = smov 116   ;;  %vm561_vm12 = vcmask 982016   ;;  %vm481_vm13 = vcmask 23552   ;;  %vm699_vm14 = vcmask 965632   ;;  %vm926_vm15 = vcmask 932864  }
  0x12   :  { %s1118_s30 = smov 114   ;;  %s1119_s3 = smov 4  }
  0x13   :  { %s1120_s4 = smov 5   ;;  %s1121_s5 = smov 6  }
  0x14   :  { %s1122_s6 = smov 7   ;;  %s1123_s7 = smov 121  }
  0x15   :  { %108 = vrot.lane.b32.xlu1 %v1160_v3, %s1108_s0  ;;  %104 = vrot.lane.b32.xlu0 %v1162_v4, %s1108_s0  ;;  %s1124_s8 = smov [#allocation8]   ;;  %s980_s12 = sshll.u32 %s1829_s2, 4  ;;  %s981_s12 = int_to_ptr.hbm [resolvable:$true] %s980_s12 }
  0x16   :  { %112 = vrot.lane.b32.xlu2 %v1164_v5, %s1108_s0  ;;  %s978_s9 = sshll.u32 %s1124_s8, 4  ;;  %s1125_s13 = smov 128   ;;  %s979_s9 = int_to_ptr.vmem [resolvable:$true] %s978_s9 }
  0x17   :  { %s1126_s14 = smov 8  }
  0x1d   :  { %116 = vrot.lane.b32.xlu1 %v1172_v6, %s1108_s0  ;;  %114 = vrot.lane.b32.xlu0 %v1174_v7, %s1108_s0 }
  0x1e   :  { %139 = vrot.lane.b32.xlu2 %v1150_v1, %s1109_s1 }
  0x25   :  { %143 = vrot.lane.b32.xlu1 %v1148_v0, %s1109_s1  ;;  %141 = vrot.lane.b32.xlu0 %v1162_v4, %s1109_s1 }
  0x26   :  { %145 = vrot.lane.b32.xlu2 %v1160_v3, %s1109_s1 }
  0x2d   :  { %149 = vrot.lane.b32.xlu1 %v1164_v5, %s1109_s1  ;;  %147 = vrot.lane.b32.xlu0 %v1156_v2, %s1109_s1 }
  0x2e   :  { %151 = vrot.lane.b32.xlu2 %v1174_v7, %s1109_s1 }
  0x35   :  { %153 = vrot.lane.b32.xlu0 %v1172_v6, %s1109_s1  ;;  %283 = vrot.lane.b32.xlu1 %v1148_v0, %s1110_s22 }
  0x36   :  { %279 = vrot.lane.b32.xlu2 %v1150_v1, %s1110_s22 }
  0x3d   :  { %281 = vrot.lane.b32.xlu0 %v1162_v4, %s1110_s22  ;;  %289 = vrot.lane.b32.xlu1 %v1164_v5, %s1110_s22 }
  0x3e   :  { %285 = vrot.lane.b32.xlu2 %v1160_v3, %s1110_s22 }
  0x45   :  { %287 = vrot.lane.b32.xlu0 %v1156_v2, %s1110_s22  ;;  %419 = vrot.lane.b32.xlu1 %v1150_v1, %s1111_s23 }
  0x46   :  { %291 = vrot.lane.b32.xlu2 %v1174_v7, %s1110_s22 }
  0x4d   :  { %293 = vrot.lane.b32.xlu0 %v1172_v6, %s1110_s22  ;;  %425 = vrot.lane.b32.xlu1 %v1160_v3, %s1111_s23 }
  0x4e   :  { %421 = vrot.lane.b32.xlu2 %v1162_v4, %s1111_s23 }
  0x55   :  { %423 = vrot.lane.b32.xlu0 %v1148_v0, %s1111_s23 }
  0x56   :  { %427 = vrot.lane.b32.xlu2 %v1156_v2, %s1111_s23 }
  0x5d   :  { %429 = vrot.lane.b32.xlu0 %v1164_v5, %s1111_s23 }
  0x5e   :  { %431 = vrot.lane.b32.xlu2 %v1174_v7, %s1111_s23 }
  0x65   :  { %433 = vrot.lane.b32.xlu0 %v1172_v6, %s1111_s23 }
  0x68   :  { %v111_v8 = vpop.permute.xlu2 %110 }
  0x70   :  { %v113_v9 = vpop.permute.xlu2 %112 }
  0x71   :  { %v136_v28 = vadd.f32 %v113_v9, %v1164_v5  ;;  %v121_v44 = vsel %vm118_vm0, %v111_v8, %v113_v9 }
  0x72   :  { %v135_v48 = vadd.f32 %v121_v44, %v1156_v2 }
  0x78   :  { %v140_v10 = vpop.permute.xlu2 %139 }
  0x7f   :  { %v107_v11 = vpop.permute.xlu1 %106  ;;  %v103_v12 = vpop.permute.xlu0 %102 }
  0x80   :  { %v146_v13 = vpop.permute.xlu2 %145 }
  0x87   :  { %v109_v14 = vpop.permute.xlu1 %108  ;;  %v105_v15 = vpop.permute.xlu0 %104 }
  0x88   :  { %v134_v16 = vadd.f32 %v109_v14, %v1160_v3  ;;  %v119_v20 = vsel %vm118_vm0, %v103_v12, %v105_v15  ;;  %v132_v21 = vadd.f32 %v105_v15, %v1162_v4  ;;  %v120_v32 = vsel %vm118_vm0, %v107_v11, %v109_v14  ;;  %v152_v33 = vpop.permute.xlu2 %151 }
  0x89   :  { %v131_v22 = vadd.f32 %v119_v20, %v1150_v1  ;;  %v133_v36 = vadd.f32 %v120_v32, %v1148_v0 }
  0x8a   :  { %v1205_v17 = vadd.f32 %v146_v13, %v134_v16 }
  0x8c   :  { %249 = vrot.lane.b32.xlu0 %v1205_v17, %s1108_s0  ;;  %v187_v50 = vrot.slane %v1205_v17, 1  ;;  %v218_v53 = vrot.slane %v1205_v17, 5 }
  0x8f   :  { %v117_v18 = vpop.permute.xlu1 %116  ;;  %v115_v19 = vpop.permute.xlu0 %114 }
  0x90   :  { %v122_v34 = vsel %vm118_vm0, %v115_v19, %v117_v18  ;;  %v138_v37 = vadd.f32 %v117_v18, %v1172_v6  ;;  %v280_v45 = vpop.permute.xlu2 %279 }
  0x91   :  { %v137_v38 = vadd.f32 %v122_v34, %v1174_v7 }
  0x97   :  { %v144_v23 = vpop.permute.xlu1 %143  ;;  %v142_v24 = vpop.permute.xlu0 %141 }
  0x98   :  { %v156_v25 = vsel %vm155_vm1, %v140_v10, %v142_v24  ;;  %v169_v26 = vadd.f32 %v142_v24, %v132_v21  ;;  %v157_v35 = vsel %vm155_vm1, %v144_v23, %v146_v13  ;;  %v286_v59 = vpop.permute.xlu2 %285 }
  0x99   :  { %v168_v27 = vadd.f32 %v156_v25, %v131_v22  ;;  %v170_v40 = vadd.f32 %v157_v35, %v133_v36 }
  0x9a   :  { %245 = vrot.lane.b32.xlu1 %v169_v26, %s1108_s0  ;;  %v186_v46 = vrot.slane %v169_v26, 1 }
  0x9b   :  { %243 = vrot.lane.b32.xlu0 %v168_v27, %s1108_s0  ;;  %v184_v62 = vrot.slane %v170_v40, 1  ;;  %v183_v10 = vrot.slane %v168_v27, 1  ;;  %v215_v16 = vrot.slane %v170_v40, 5 }
  0x9c   :  { %v188_v55 = vsel %vm182_vm3, %v186_v46, %v187_v50 }
  0x9d   :  { %v185_v14 = vsel %vm182_vm3, %v183_v10, %v184_v62 }
  0x9f   :  { %v150_v29 = vpop.permute.xlu1 %149  ;;  %v148_v30 = vpop.permute.xlu0 %147 }
  0xa0   :  { %v173_v31 = vadd.f32 %v150_v29, %v136_v28  ;;  %v158_v47 = vsel %vm155_vm1, %v148_v30, %v150_v29  ;;  %v292_v11 = vpop.permute.xlu2 %291 }
  0xa1   :  { %v172_v52 = vadd.f32 %v158_v47, %v135_v48 }
  0xa2   :  { %253 = vrot.lane.b32.xlu2 %v173_v31, %s1108_s0  ;;  %v219_v49 = vrot.slane %v173_v31, 5  ;;  %v191_v58 = vrot.slane %v173_v31, 1 }
  0xa3   :  { %v189_v60 = vrot.slane %v172_v52, 1  ;;  %v216_v15 = vrot.slane %v172_v52, 5 }
  0xa4   :  { %v220_v56 = vsel %vm214_vm4, %v218_v53, %v219_v49  ;;  %v192_v63 = vsel %vm182_vm3, %v187_v50, %v191_v58 }
  0xa5   :  { %v190_v9 = vsel %vm182_vm3, %v184_v62, %v189_v60  ;;  %v217_v17 = vsel %vm214_vm4, %v215_v16, %v216_v15 }
  0xa7   :  { %v154_v39 = vpop.permute.xlu0 %153  ;;  %v284_v22 = vpop.permute.xlu1 %283 }
  0xa8   :  { %v159_v41 = vsel %vm155_vm1, %v152_v33, %v154_v39  ;;  %v175_v42 = vadd.f32 %v154_v39, %v138_v37  ;;  %v1281_v20 = vpop.permute.xlu2 %421  ;;  %v297_v39 = vsel %vm295_vm2, %v284_v22, %v286_v59  ;;  %vm824_vm1 = vcmask 949248  }
  0xa9   :  { %v174_v43 = vadd.f32 %v159_v41, %v137_v38 }
  0xaa   :  { %247 = vrot.lane.b32.xlu2 %v170_v40, %s1108_s0  ;;  %257 = vrot.lane.b32.xlu1 %v175_v42, %s1108_s0  ;;  %v223_v57 = vrot.slane %v175_v42, 5 }
  0xab   :  { %255 = vrot.lane.b32.xlu0 %v174_v43, %s1108_s0  ;;  %v221_v18 = vrot.slane %v174_v43, 5 }
  0xac   :  { %v224_v8 = vsel %vm214_vm4, %v219_v49, %v223_v57 }
  0xad   :  { %v222_v19 = vsel %vm214_vm4, %v216_v15, %v221_v18 }
  0xaf   :  { %v1231_v51 = vpop.permute.xlu0 %281  ;;  %v290_v25 = vpop.permute.xlu1 %289 }
  0xb0   :  { %v1236_v54 = vsel %vm295_vm2, %v280_v45, %v1231_v51  ;;  %v1287_v23 = vpop.permute.xlu2 %427 }
  0xb2   :  { %195 = vrot.lane.b32.xlu2 %v188_v55, %s1112_s24  ;;  %251 = vrot.lane.b32.xlu1 %v172_v52, %s1108_s0 }
  0xb3   :  { %227 = vrot.lane.b32.xlu0 %v220_v56, %s1112_s24 }
  0xb7   :  { %v1243_v61 = vpop.permute.xlu0 %287  ;;  %v1297_v28 = vpop.permute.xlu1 %419 }
  0xb8   :  { %v1293_v26 = vpop.permute.xlu2 %431  ;;  %v298_v16 = vsel %vm295_vm2, %v1243_v61, %v290_v25  ;;  %v83_v61 = vrot.slane %v1156_v2, 6 }
  0xba   :  { %199 = vrot.lane.b32.xlu1 %v192_v63, %s1112_s24  ;;  %231 = vrot.lane.b32.xlu2 %v224_v8, %s1112_s24 }
  0xbb   :  { %197 = vrot.lane.b32.xlu0 %v190_v9, %s1112_s24 }
  0xbf   :  { %v1251_v12 = vpop.permute.xlu0 %293  ;;  %v1309_v35 = vpop.permute.xlu1 %425 }
  0xc0   :  { %v1255_v13 = vsel %vm295_vm2, %v292_v11, %v1251_v12  ;;  %vm606_vm2 = vcmask 31744  }
  0xc2   :  { %193 = vrot.lane.b32.xlu1 %v185_v14, %s1112_s24  ;;  %549 = vrot.lane.b32.xlu2 %v1148_v0, %s1113_s25 }
  0xc3   :  { %545 = vrot.lane.b32.xlu0 %v1150_v1, %s1113_s25 }
  0xc7   :  { %v1283_v21 = vpop.permute.xlu0 %423 }
  0xca   :  { %547 = vrot.lane.b32.xlu1 %v1162_v4, %s1113_s25  ;;  %225 = vrot.lane.b32.xlu2 %v217_v17, %s1112_s24 }
  0xcb   :  { %551 = vrot.lane.b32.xlu0 %v1160_v3, %s1113_s25 }
  0xcf   :  { %v1289_v24 = vpop.permute.xlu0 %429 }
  0xd2   :  { %553 = vrot.lane.b32.xlu1 %v1156_v2, %s1113_s25  ;;  %555 = vrot.lane.b32.xlu2 %v1164_v5, %s1113_s25 }
  0xd3   :  { %683 = vrot.lane.b32.xlu0 %v1150_v1, %s1114_s26 }
  0xd7   :  { %v1295_v27 = vpop.permute.xlu0 %433 }
  0xda   :  { %229 = vrot.lane.b32.xlu1 %v222_v19, %s1112_s24  ;;  %687 = vrot.lane.b32.xlu2 %v1148_v0, %s1114_s26 }
  0xdb   :  { %689 = vrot.lane.b32.xlu0 %v1160_v3, %s1114_s26 }
  0xe2   :  { %685 = vrot.lane.b32.xlu1 %v1162_v4, %s1114_s26 }
  0xea   :  { %691 = vrot.lane.b32.xlu1 %v1156_v2, %s1114_s26 }
  0xfc   :  { %v254_v29 = vpop.permute.xlu2 %253 }
  0xfd   :  { %v276_v30 = vadd.f32 %v254_v29, %v1164_v5 }
  0xfe   :  { %v250_v31 = vpop.permute.xlu0 %249 }
  0xff   :  { %v1300_v32 = vadd.f32 %v290_v25, %v276_v30  ;;  %v274_v33 = vadd.f32 %v250_v31, %v1160_v3 }
 0x101   :  { %v1303_v34 = vadd.f32 %v286_v59, %v274_v33  ;;  %393 = vrot.lane.b32.xlu2 %v1300_v32, %s1108_s0  ;;  %v359_v63 = vrot.slane %v1300_v32, 4 }
 0x103   :  { %389 = vrot.lane.b32.xlu0 %v1303_v34, %s1108_s0  ;;  %v327_v50 = vrot.slane %v1303_v34, 2  ;;  %v358_v14 = vrot.slane %v1303_v34, 4 }
 0x104   :  { %v248_v36 = vpop.permute.xlu2 %247 }
 0x105   :  { %v260_v37 = vsel %vm118_vm0, %v248_v36, %v250_v31  ;;  %v360_v18 = vsel %vm354_vm6, %v358_v14, %v359_v63  ;;  %v85_v31 = vrot.slane %v1160_v3, 6  ;;  %v86_v36 = vrot.slane %v1164_v5, 6 }
 0x106   :  { %v273_v38 = vadd.f32 %v260_v37, %v1148_v0 }
 0x108   :  { %v1314_v40 = vadd.f32 %v297_v39, %v273_v38 }
 0x10a   :  { %387 = vrot.lane.b32.xlu2 %v1314_v40, %s1108_s0  ;;  %v355_v22 = vrot.slane %v1314_v40, 4 }
 0x10c   :  { %v246_v41 = vpop.permute.xlu1 %245  ;;  %v1318_v42 = vpop.permute.xlu2 %195 }
 0x10d   :  { %v272_v43 = vadd.f32 %v246_v41, %v1162_v4  ;;  %v244_v44 = vpop.permute.xlu0 %243 }
 0x10e   :  { %v259_v45 = vsel %vm118_vm0, %v244_v44, %v246_v41  ;;  %v87_v44 = vsel %vm81_vm8, %v85_v31, %v86_v36 }
 0x10f   :  { %v309_v46 = vadd.f32 %v1231_v51, %v272_v43  ;;  %v271_v47 = vadd.f32 %v259_v45, %v1150_v1  ;;  %v331_v43 = vrot.slane %v1300_v32, 2  ;;  %v324_v45 = vrot.slane %v1314_v40, 2 }
 0x111   :  { %v326_v48 = vrot.slane %v309_v46, 2  ;;  %385 = vrot.lane.b32.xlu1 %v309_v46, %s1108_s0  ;;  %v1326_v49 = vadd.f32 %v1236_v54, %v271_v47  ;;  %v332_v46 = vsel %vm322_vm5, %v327_v50, %v331_v43 }
 0x113   :  { %383 = vrot.lane.b32.xlu0 %v1326_v49, %s1108_s0  ;;  %v328_v52 = vsel %vm322_vm5, %v326_v48, %v327_v50 }
 0x114   :  { %v1332_v53 = vpop.permute.xlu2 %231  ;;  %335 = vrot.lane.b32.xlu2 %v328_v52, %s1115_s27  ;;  %v97_v52 = vadd.f32 %v87_v44, %v1162_v4 }
 0x11c   :  { %v258_v51 = vpop.permute.xlu1 %257  ;;  %v1335_v55 = vpop.permute.xlu2 %549 }
 0x11d   :  { %v278_v56 = vadd.f32 %v258_v51, %v1172_v6  ;;  %v256_v54 = vpop.permute.xlu0 %255 }
 0x11e   :  { %v262_v57 = vsel %vm118_vm0, %v256_v54, %v258_v51 }
 0x11f   :  { %v315_v58 = vadd.f32 %v1251_v12, %v278_v56  ;;  %v277_v59 = vadd.f32 %v262_v57, %v1174_v7  ;;  %v323_v56 = vrot.slane %v1326_v49, 2 }
 0x121   :  { %v363_v60 = vrot.slane %v315_v58, 4  ;;  %397 = vrot.lane.b32.xlu1 %v315_v58, %s1108_s0  ;;  %v314_v62 = vadd.f32 %v1255_v13, %v277_v59  ;;  %v325_v58 = vsel %vm322_vm5, %v323_v56, %v324_v45 }
 0x123   :  { %395 = vrot.lane.b32.xlu0 %v314_v62, %s1108_s0  ;;  %v364_v8 = vsel %vm354_vm6, %v359_v63, %v363_v60  ;;  %v361_v19 = vrot.slane %v314_v62, 4  ;;  %v88_v60 = vrot.slane %v1174_v7, 6  ;;  %v90_v62 = vrot.slane %v1172_v6, 6 }
 0x124   :  { %v252_v9 = vpop.permute.xlu1 %251  ;;  %v226_v10 = vpop.permute.xlu2 %225  ;;  %371 = vrot.lane.b32.xlu2 %v364_v8, %s1115_s27 }
 0x125   :  { %v261_v11 = vsel %vm118_vm0, %v252_v9, %v254_v29  ;;  %v228_v12 = vpop.permute.xlu0 %227  ;;  %v82_v29 = vrot.slane %v1148_v0, 6  ;;  %v91_v63 = vsel %vm81_vm8, %v86_v36, %v90_v62 }
 0x126   :  { %v275_v15 = vadd.f32 %v261_v11, %v1156_v2  ;;  %v233_v13 = vsel %vm201_vm7, %v226_v10, %v228_v12 }
 0x127   :  { %v84_v41 = vsel %vm81_vm8, %v82_v29, %v83_v61 }
 0x128   :  { %v312_v17 = vadd.f32 %v298_v16, %v275_v15  ;;  %v96_v47 = vadd.f32 %v84_v41, %v1150_v1 }
 0x12a   :  { %391 = vrot.lane.b32.xlu1 %v312_v17, %s1108_s0  ;;  %v356_v30 = vrot.slane %v312_v17, 4  ;;  %v329_v39 = vrot.slane %v312_v17, 2 }
 0x12b   :  { %367 = vrot.lane.b32.xlu0 %v360_v18, %s1115_s27 }
 0x12c   :  { %v200_v33 = vpop.permute.xlu1 %199  ;;  %v357_v34 = vsel %vm354_vm6, %v355_v22, %v356_v30  ;;  %v362_v25 = vsel %vm354_vm6, %v356_v30, %v361_v19  ;;  %v330_v48 = vsel %vm322_vm5, %v324_v45, %v329_v39  ;;  %v1394_v9 = vpop.permute.xlu2 %555  ;;  %v437_v45 = vsel %vm435_vm9, %v1283_v21, %v1309_v35 }
 0x12d   :  { %365 = vrot.lane.b32.xlu2 %v357_v34, %s1115_s27  ;;  %v198_v37 = vpop.permute.xlu0 %197 }
 0x12e   :  { %v203_v38 = vsel %vm201_vm7, %v198_v37, %v200_v33 }
 0x132   :  { %339 = vrot.lane.b32.xlu1 %v332_v46, %s1115_s27 }
 0x133   :  { %337 = vrot.lane.b32.xlu0 %v330_v48, %s1115_s27 }
 0x134   :  { %v194_v51 = vpop.permute.xlu1 %193  ;;  %v1405_v18 = vpop.permute.xlu2 %687 }
 0x135   :  { %v202_v32 = vsel %vm201_vm7, %v194_v51, %v1318_v42  ;;  %v208_v54 = vadd.f32 %v194_v51, %v96_v47  ;;  %v89_v42 = vsel %vm81_vm8, %v83_v61, %v88_v60  ;;  %v1401_v16 = vpop.permute.xlu0 %545  ;;  %v436_v51 = vsel %vm435_vm9, %v1297_v28, %v1281_v20 }
 0x136   :  { %v209_v40 = vadd.f32 %v202_v32, %v97_v52  ;;  %v98_v8 = vadd.f32 %v89_v42, %v1148_v0 }
 0x137   :  { %v1378_v57 = vadd.f32 %v226_v10, %v208_v54  ;;  %v99_v10 = vadd.f32 %v91_v63, %v1160_v3 }
 0x138   :  { %v1380_v50 = vadd.f32 %v233_v13, %v209_v40  ;;  %v210_v11 = vadd.f32 %v198_v37, %v98_v8 }
 0x139   :  { %v211_v12 = vadd.f32 %v203_v38, %v99_v10 }
 0x13a   :  { %333 = vrot.lane.b32.xlu1 %v325_v58, %s1115_s27 }
 0x13c   :  { %v1384_v59 = vpop.permute.xlu1 %547 }
 0x13d   :  { %v1407_v19 = vpop.permute.xlu0 %551 }
 0x142   :  { %369 = vrot.lane.b32.xlu1 %v362_v25, %s1115_s27 }
 0x144   :  { %v1390_v49 = vpop.permute.xlu1 %553 }
 0x14c   :  { %v230_v14 = vpop.permute.xlu1 %229 }
 0x14d   :  { %v234_v15 = vsel %vm201_vm7, %v230_v14, %v1332_v53  ;;  %v1399_v13 = vadd.f32 %v230_v14, %v210_v11  ;;  %v1415_v53 = vpop.permute.xlu0 %683  ;;  %v439_v14 = vsel %vm435_vm9, %v1293_v26, %v1295_v27 }
 0x14e   :  { %v1403_v17 = vadd.f32 %v234_v15, %v211_v12 }
 0x154   :  { %v1419_v33 = vpop.permute.xlu1 %685 }
 0x155   :  { %v1417_v31 = vpop.permute.xlu0 %689 }
 0x15b   :  { %v394_v22 = vpop.permute.xlu2 %393 }
 0x15c   :  { %v416_v30 = vadd.f32 %v394_v22, %v1164_v5  ;;  %v1423_v36 = vpop.permute.xlu1 %691 }
 0x15e   :  { %v1411_v29 = vadd.f32 %v1289_v24, %v416_v30 }
 0x160   :  { %519 = vrot.lane.b32.xlu2 %v1411_v29, %s1108_s0 }
 0x164   :  { %v388_v37 = vpop.permute.xlu2 %387 }
 0x16e   :  { %v336_v32 = vpop.permute.xlu2 %335 }
 0x175   :  { %v390_v34 = vpop.permute.xlu0 %389 }
 0x176   :  { %v414_v61 = vadd.f32 %v390_v34, %v1160_v3  ;;  %v400_v38 = vsel %vm118_vm0, %v388_v37, %v390_v34 }
 0x177   :  { %v413_v39 = vadd.f32 %v400_v38, %v1148_v0  ;;  %v438_v38 = vsel %vm435_vm9, %v1287_v23, %v1289_v24 }
 0x178   :  { %v451_v25 = vadd.f32 %v1309_v35, %v414_v61  ;;  %v471_v35 = vrot.slane %v1411_v29, 3 }
 0x179   :  { %v450_v52 = vadd.f32 %v437_v45, %v413_v39 }
 0x17a   :  { %515 = vrot.lane.b32.xlu0 %v451_v25, %s1108_s0  ;;  %v467_v54 = vrot.slane %v451_v25, 3 }
 0x17b   :  { %v464_v21 = vrot.slane %v450_v52, 3 }
 0x17c   :  { %v472_v60 = vsel %vm462_vm10, %v467_v54, %v471_v35 }
 0x183   :  { %v386_v41 = vpop.permute.xlu1 %385 }
 0x184   :  { %v412_v43 = vadd.f32 %v386_v41, %v1162_v4 }
 0x185   :  { %v384_v44 = vpop.permute.xlu0 %383 }
 0x186   :  { %v449_v46 = vadd.f32 %v1281_v20, %v412_v43  ;;  %v399_v47 = vsel %vm118_vm0, %v384_v44, %v386_v41  ;;  %v372_v20 = vpop.permute.xlu2 %371 }
 0x187   :  { %v411_v48 = vadd.f32 %v399_v47, %v1150_v1 }
 0x188   :  { %511 = vrot.lane.b32.xlu1 %v449_v46, %s1108_s0  ;;  %v466_v11 = vrot.slane %v449_v46, 3 }
 0x189   :  { %v448_v56 = vadd.f32 %v436_v51, %v411_v48 }
 0x18a   :  { %v468_v39 = vsel %vm462_vm10, %v466_v11, %v467_v54 }
 0x18b   :  { %509 = vrot.lane.b32.xlu0 %v448_v56, %s1108_s0  ;;  %v463_v40 = vrot.slane %v448_v56, 3 }
 0x18d   :  { %v465_v58 = vsel %vm462_vm10, %v463_v40, %v464_v21 }
 0x18e   :  { %v366_v15 = vpop.permute.xlu2 %365 }
 0x190   :  { %479 = vrot.lane.b32.xlu1 %v472_v60, %s1116_s28 }
 0x193   :  { %v398_v28 = vpop.permute.xlu1 %397  ;;  %557 = vrot.lane.b32.xlu0 %v1174_v7, %s1113_s25 }
 0x194   :  { %v418_v62 = vadd.f32 %v398_v28, %v1172_v6 }
 0x195   :  { %v396_v42 = vpop.permute.xlu0 %395 }
 0x196   :  { %v455_v63 = vadd.f32 %v1295_v27, %v418_v62  ;;  %v402_v8 = vsel %vm118_vm0, %v396_v42, %v398_v28 }
 0x197   :  { %v417_v10 = vadd.f32 %v402_v8, %v1174_v7 }
 0x198   :  { %523 = vrot.lane.b32.xlu2 %v455_v63, %s1108_s0  ;;  %v496_v34 = vrot.slane %v455_v63, 3 }
 0x199   :  { %v454_v37 = vadd.f32 %v439_v14, %v417_v10 }
 0x19a   :  { %v497_v27 = vsel %vm462_vm10, %v471_v35, %v496_v34 }
 0x19b   :  { %812 = vrot.lane.b32.xlu0 %v1150_v1, %s1117_s29 }
 0x19c   :  { %v392_v12 = vpop.permute.xlu1 %391 }
 0x19d   :  { %v401_v30 = vsel %vm118_vm0, %v392_v12, %v394_v22  ;;  %v368_v29 = vpop.permute.xlu0 %367  ;;  %v494_v22 = vrot.slane %v454_v37, 3 }
 0x19e   :  { %v415_v61 = vadd.f32 %v401_v30, %v1156_v2  ;;  %v373_v25 = vsel %vm341_vm11, %v366_v15, %v368_v29 }
 0x1a0   :  { %475 = vrot.lane.b32.xlu2 %v468_v39, %s1116_s28  ;;  %v452_v41 = vadd.f32 %v438_v38, %v415_v61 }
 0x1a2   :  { %v469_v26 = vrot.slane %v452_v41, 3  ;;  %517 = vrot.lane.b32.xlu1 %v452_v41, %s1108_s0 }
 0x1a3   :  { %500 = vrot.lane.b32.xlu0 %v497_v27, %s1116_s28  ;;  %v563_v27 = vsel %vm561_vm12, %v1335_v55, %v1407_v19 }
 0x1a4   :  { %v340_v43 = vpop.permute.xlu1 %339  ;;  %v470_v44 = vsel %vm462_vm10, %v464_v21, %v469_v26  ;;  %v495_v45 = vsel %vm462_vm10, %v469_v26, %v494_v22 }
 0x1a5   :  { %v1469_v46 = vpop.permute.xlu0 %337 }
 0x1a6   :  { %v343_v23 = vsel %vm341_vm11, %v1469_v46, %v340_v43 }
 0x1a7   :  { %v351_v24 = vadd.f32 %v343_v23, %v1403_v17 }
 0x1a8   :  { %513 = vrot.lane.b32.xlu2 %v450_v52, %s1108_s0 }
 0x1aa   :  { %559 = vrot.lane.b32.xlu1 %v1172_v6, %s1113_s25 }
 0x1ab   :  { %477 = vrot.lane.b32.xlu0 %v470_v44, %s1116_s28 }
 0x1ac   :  { %v334_v47 = vpop.permute.xlu1 %333 }
 0x1ad   :  { %v342_v48 = vsel %vm341_vm11, %v334_v47, %v336_v32  ;;  %v348_v51 = vadd.f32 %v334_v47, %v1378_v57 }
 0x1ae   :  { %v349_v56 = vadd.f32 %v342_v48, %v1380_v50 }
 0x1af   :  { %v1481_v54 = vadd.f32 %v366_v15, %v348_v51 }
 0x1b0   :  { %693 = vrot.lane.b32.xlu2 %v1164_v5, %s1114_s26  ;;  %v1485_v17 = vadd.f32 %v373_v25, %v349_v56  ;;  %v562_v25 = vsel %vm561_vm12, %v1401_v16, %v1384_v59  ;;  %v564_v56 = vsel %vm561_vm12, %v1390_v49, %v1394_v9 }
 0x1b2   :  { %814 = vrot.lane.b32.xlu1 %v1162_v4, %s1117_s29 }
 0x1b4   :  { %v1489_v52 = vpop.permute.xlu1 %369 }
 0x1b5   :  { %v374_v40 = vsel %vm341_vm11, %v1489_v52, %v372_v20 }
 0x1b6   :  { %v1493_v32 = vadd.f32 %v374_v40, %v351_v24 }
 0x1b8   :  { %816 = vrot.lane.b32.xlu2 %v1148_v0, %s1117_s29 }
 0x1ba   :  { %521 = vrot.lane.b32.xlu1 %v454_v37, %s1108_s0  ;;  %v520_v57 = vpop.permute.xlu2 %519 }
 0x1bb   :  { %v542_v50 = vadd.f32 %v520_v57, %v1164_v5 }
 0x1bd   :  { %v1502_v21 = vadd.f32 %v1394_v9, %v542_v50  ;;  %v350_v50 = vadd.f32 %v1469_v46, %v1399_v13 }
 0x1bf   :  { %v623_v62 = vrot.slane %v1502_v21, 2  ;;  %v596_v63 = vrot.slane %v1502_v21, 4  ;;  %v381_v49 = vadd.f32 %v1489_v52, %v350_v50 }
 0x1c0   :  { %498 = vrot.lane.b32.xlu2 %v495_v45, %s1116_s28 }
 0x1c2   :  { %473 = vrot.lane.b32.xlu1 %v465_v58, %s1116_s28 }
 0x1c8   :  { %657 = vrot.lane.b32.xlu2 %v1502_v21, %s1108_s0 }
 0x1ec   :  { %v516_v35 = vpop.permute.xlu0 %515 }
 0x1ed   :  { %v540_v60 = vadd.f32 %v516_v35, %v1160_v3 }
 0x1ef   :  { %v577_v20 = vadd.f32 %v1407_v19, %v540_v60 }
 0x1f1   :  { %653 = vrot.lane.b32.xlu0 %v577_v20, %s1108_s0  ;;  %v622_v28 = vrot.slane %v577_v20, 2  ;;  %v592_v42 = vrot.slane %v577_v20, 4 }
 0x1f2   :  { %v1511_v58 = vpop.permute.xlu2 %523 }
 0x1f3   :  { %v1516_v8 = vsel %vm322_vm5, %v622_v28, %v623_v62  ;;  %v1519_v10 = vsel %vm354_vm6, %v592_v42, %v596_v63  ;;  %v544_v28 = vadd.f32 %v1511_v58, %v1172_v6 }
 0x1fa   :  { %v512_v11 = vpop.permute.xlu1 %511  ;;  %v1521_v12 = vpop.permute.xlu2 %475 }
 0x1fb   :  { %v538_v14 = vadd.f32 %v512_v11, %v1162_v4 }
 0x1fd   :  { %v575_v15 = vadd.f32 %v1384_v59, %v538_v14  ;;  %v510_v30 = vpop.permute.xlu0 %509 }
 0x1fe   :  { %v525_v29 = vsel %vm118_vm0, %v510_v30, %v512_v11 }
 0x1ff   :  { %v591_v34 = vrot.slane %v575_v15, 4  ;;  %v537_v61 = vadd.f32 %v525_v29, %v1150_v1  ;;  %649 = vrot.lane.b32.xlu1 %v575_v15, %s1108_s0 }
 0x201   :  { %v574_v37 = vadd.f32 %v562_v25, %v537_v61  ;;  %v1532_v38 = vsel %vm354_vm6, %v591_v34, %v592_v42 }
 0x202   :  { %v514_v39 = vpop.permute.xlu2 %513  ;;  %v480_v23 = vpop.permute.xlu1 %479 }
 0x203   :  { %v526_v41 = vsel %vm118_vm0, %v514_v39, %v516_v35  ;;  %647 = vrot.lane.b32.xlu0 %v574_v37, %s1108_s0  ;;  %v588_v44 = vrot.slane %v574_v37, 4 }
 0x204   :  { %v539_v26 = vadd.f32 %v526_v41, %v1148_v0 }
 0x205   :  { %v558_v22 = vpop.permute.xlu0 %557 }
 0x206   :  { %v576_v43 = vadd.f32 %v563_v27, %v539_v26 }
 0x208   :  { %651 = vrot.lane.b32.xlu2 %v576_v43, %s1108_s0  ;;  %v589_v59 = vrot.slane %v576_v43, 4  ;;  %v619_v20 = vrot.slane %v576_v43, 2 }
 0x20a   :  { %v1541_v16 = vpop.permute.xlu2 %693  ;;  %v590_v45 = vsel %vm354_vm6, %v588_v44, %v589_v59 }
 0x20b   :  { %818 = vrot.lane.b32.xlu0 %v1160_v3, %s1117_s29 }
 0x20d   :  { %v1546_v24 = vpop.permute.xlu0 %812 }
 0x210   :  { %822 = vrot.lane.b32.xlu2 %v1164_v5, %s1117_s29 }
 0x212   :  { %v1550_v55 = vpop.permute.xlu2 %816 }
 0x213   :  { %697 = vrot.lane.b32.xlu0 %v1172_v6, %s1114_s26 }
 0x214   :  { %v518_v19 = vpop.permute.xlu1 %517 }
 0x215   :  { %v527_v47 = vsel %vm118_vm0, %v518_v19, %v520_v57  ;;  %v501_v48 = vpop.permute.xlu0 %500 }
 0x216   :  { %v541_v51 = vadd.f32 %v527_v47, %v1156_v2 }
 0x218   :  { %695 = vrot.lane.b32.xlu2 %v1174_v7, %s1114_s26  ;;  %v578_v40 = vadd.f32 %v564_v56, %v541_v51 }
 0x21a   :  { %655 = vrot.lane.b32.xlu1 %v578_v40, %s1108_s0  ;;  %v499_v35 = vpop.permute.xlu2 %498  ;;  %v594_v60 = vrot.slane %v578_v40, 4  ;;  %v620_v57 = vrot.slane %v578_v40, 2 }
 0x21b   :  { %v502_v42 = vsel %vm481_vm13, %v499_v35, %v501_v48 }
 0x21c   :  { %v560_v9 = vpop.permute.xlu1 %559  ;;  %v1569_v63 = vsel %vm354_vm6, %v589_v59, %v594_v60  ;;  %v1572_v11 = vsel %vm322_vm5, %v619_v20, %v620_v57 }
 0x21d   :  { %v581_v13 = vadd.f32 %v560_v9, %v544_v28  ;;  %v1574_v46 = vpop.permute.xlu0 %477 }
 0x21e   :  { %v483_v14 = vsel %vm481_vm13, %v1574_v46, %v480_v23  ;;  %v490_v15 = vadd.f32 %v1574_v46, %v381_v49 }
 0x21f   :  { %v627_v6 = vrot.slane %v581_v13, 2  ;;  %v491_v30 = vadd.f32 %v483_v14, %v1493_v32 }
 0x220   :  { %916 = vrot.lane.b32.xlu2 %v1162_v4, %s1118_s30  ;;  %v1582_v52 = vadd.f32 %v499_v35, %v490_v15 }
 0x221   :  { %v1587_v29 = vsel %vm322_vm5, %v623_v62, %v627_v6  ;;  %v1589_v34 = vadd.f32 %v502_v42, %v491_v30  ;;  %v565_v62 = vsel %vm561_vm12, %v558_v22, %v560_v9  ;;  %v700_v9 = vsel %vm699_vm14, %v1415_v53, %v1419_v33 }
 0x222   :  { %820 = vrot.lane.b32.xlu1 %v1156_v2, %s1117_s29  ;;  %v1595_v25 = vpop.permute.xlu2 %657 }
 0x223   :  { %v680_v32 = vadd.f32 %v1595_v25, %v1164_v5 }
 0x224   :  { %v1593_v61 = vpop.permute.xlu1 %814 }
 0x225   :  { %v1605_v39 = vadd.f32 %v1541_v16, %v680_v32 }
 0x227   :  { %v761_v56 = vrot.slane %v1605_v39, 1  ;;  %v734_v50 = vrot.slane %v1605_v39, 5 }
 0x228   :  { %598 = vrot.lane.b32.xlu2 %v590_v45, %s1119_s3 }
 0x22a   :  { %661 = vrot.lane.b32.xlu1 %v581_v13, %s1108_s0 }
 0x22c   :  { %v522_v21 = vpop.permute.xlu1 %521 }
 0x22d   :  { %v528_v37 = vsel %vm118_vm0, %v522_v21, %v1511_v58 }
 0x22e   :  { %v543_v41 = vadd.f32 %v528_v37, %v1174_v7 }
 0x230   :  { %795 = vrot.lane.b32.xlu2 %v1605_v39, %s1108_s0  ;;  %v580_v26 = vadd.f32 %v565_v62, %v543_v41 }
 0x232   :  { %659 = vrot.lane.b32.xlu0 %v580_v26, %s1108_s0  ;;  %v625_v27 = vrot.slane %v580_v26, 2  ;;  %914 = vrot.lane.b32.xlu1 %v1150_v1, %s1118_s30 }
 0x234   :  { %v474_v43 = vpop.permute.xlu1 %473  ;;  %v1614_v22 = vsel %vm322_vm5, %v620_v57, %v625_v27  ;;  %vm967_vm5 = vcmask 990208  }
 0x235   :  { %v482_v58 = vsel %vm481_vm13, %v474_v43, %v1521_v12  ;;  %v1619_v44 = vadd.f32 %v474_v43, %v1481_v54  ;;  %v701_v12 = vsel %vm699_vm14, %v1405_v18, %v1417_v31 }
 0x236   :  { %v489_v7 = vadd.f32 %v482_v58, %v1485_v17 }
 0x238   :  { %v1622_v59 = vadd.f32 %v489_v7, %v483_v14 }
 0x262   :  { %v652_v45 = vpop.permute.xlu2 %651 }
 0x263   :  { %v654_v23 = vpop.permute.xlu0 %653 }
 0x264   :  { %v664_v19 = vsel %vm118_vm0, %v652_v45, %v654_v23  ;;  %v678_v47 = vadd.f32 %v654_v23, %v1160_v3 }
 0x265   :  { %v677_v48 = vadd.f32 %v664_v19, %v1148_v0  ;;  %v1020_v19 = vld [vmem:[#allocation6 + $0x10] sm:$0xff] }
 0x266   :  { %v715_v54 = vadd.f32 %v1417_v31, %v678_v47 }
 0x267   :  { %v714_v51 = vadd.f32 %v701_v12, %v677_v48 }
 0x268   :  { %791 = vrot.lane.b32.xlu0 %v715_v54, %s1108_s0  ;;  %v730_v17 = vrot.slane %v715_v54, 5  ;;  %v760_v40 = vrot.slane %v715_v54, 1 }
 0x269   :  { %789 = vrot.lane.b32.xlu2 %v714_v51, %s1108_s0  ;;  %v727_v15 = vrot.slane %v714_v51, 5  ;;  %v757_v41 = vrot.slane %v714_v51, 1 }
 0x26a   :  { %v1638_v3 = vsel %vm182_vm3, %v760_v40, %v761_v56  ;;  %v1641_v18 = vsel %vm214_vm4, %v730_v17, %v734_v50  ;;  %v1645_v35 = vpop.permute.xlu2 %822 }
 0x271   :  { %v650_v31 = vpop.permute.xlu1 %649  ;;  %922 = vrot.lane.b32.xlu2 %v1156_v2, %s1118_s30 }
 0x272   :  { %v676_v60 = vadd.f32 %v650_v31, %v1162_v4  ;;  %v696_v6 = vpop.permute.xlu2 %695 }
 0x274   :  { %v713_v57 = vadd.f32 %v1419_v33, %v676_v60 }
 0x275   :  { %v648_v20 = vpop.permute.xlu0 %647 }
 0x276   :  { %v729_v28 = vrot.slane %v713_v57, 5  ;;  %v663_v42 = vsel %vm118_vm0, %v648_v20, %v650_v31  ;;  %787 = vrot.lane.b32.xlu1 %v713_v57, %s1108_s0  ;;  %v1717_v57 = vld [vmem:[#allocation3 + $0x10] sm:$0xff] }
 0x277   :  { %v675_v49 = vadd.f32 %v663_v42, %v1150_v1 }
 0x278   :  { %v1656_v13 = vsel %vm214_vm4, %v729_v28, %v730_v17 }
 0x279   :  { %602 = vrot.lane.b32.xlu2 %v1569_v63, %s1119_s3  ;;  %v712_v4 = vadd.f32 %v700_v9, %v675_v49  ;;  %v1022_v49 = vld [vmem:[#allocation3 + $0x8] sm:$0xff] }
 0x27a   :  { %v917_v53 = vpop.permute.xlu2 %916 }
 0x27b   :  { %785 = vrot.lane.b32.xlu0 %v712_v4, %s1108_s0  ;;  %v726_v14 = vrot.slane %v712_v4, 5  ;;  %v1023_v4 = vld [vmem:[#allocation6 + $0x18] sm:$0xff] }
 0x27d   :  { %v819_v30 = vpop.permute.xlu0 %818  ;;  %v1662_v32 = vsel %vm214_vm4, %v726_v14, %v727_v15 }
 0x27e   :  { %v826_v20 = vsel %vm824_vm1, %v1550_v55, %v819_v30 }
 0x281   :  { %631 = vrot.lane.b32.xlu2 %v1516_v8, %s1119_s3  ;;  %v702_v8 = vsel %vm699_vm14, %v1423_v36, %v1541_v16  ;;  %v1018_v36 = vld [vmem:[#allocation3 + $0x18] sm:$0xff]  ;;  %v1019_v16 = vld [vmem:[#allocation6 + $0x8] sm:$0xff] }
 0x283   :  { %918 = vrot.lane.b32.xlu0 %v1148_v0, %s1118_s30  ;;  %v1680_v0 = vpop.permute.xlu2 %598 }
 0x285   :  { %v1668_v1 = vpop.permute.xlu0 %697 }
 0x286   :  { %v703_v33 = vsel %vm699_vm14, %v696_v6, %v1668_v1 }
 0x28b   :  { %924 = vrot.lane.b32.xlu0 %v1164_v5, %s1118_s30 }
 0x28c   :  { %v656_v63 = vpop.permute.xlu1 %655 }
 0x28d   :  { %v665_v21 = vsel %vm118_vm0, %v656_v63, %v1595_v25 }
 0x28e   :  { %v679_v62 = vadd.f32 %v665_v21, %v1156_v2  ;;  %v1687_v2 = vpop.permute.xlu2 %795 }
 0x28f   :  { %v811_v58 = vadd.f32 %v1019_v16, %v1687_v2 }
 0x290   :  { %v716_v37 = vadd.f32 %v702_v8, %v679_v62 }
 0x291   :  { %v1696_v7 = vadd.f32 %v1645_v35, %v811_v58 }
 0x292   :  { %793 = vrot.lane.b32.xlu1 %v716_v37, %s1108_s0  ;;  %v758_v26 = vrot.slane %v716_v37, 1  ;;  %v732_v27 = vrot.slane %v716_v37, 5 }
 0x293   :  { %604 = vrot.lane.b32.xlu0 %v1519_v10, %s1119_s3 }
 0x294   :  { %v759_v5 = vsel %vm182_vm3, %v757_v41, %v758_v26  ;;  %v733_v25 = vsel %vm214_vm4, %v727_v15, %v732_v27  ;;  %v1689_v43 = vpop.permute.xlu1 %820  ;;  %vm864_vm4 = vcmask 48128  }
 0x295   :  { %v827_v27 = vsel %vm824_vm1, %v1689_v43, %v1645_v35 }
 0x29a   :  { %920 = vrot.lane.b32.xlu1 %v1018_v36, %s1118_s30 }
 0x29b   :  { %633 = vrot.lane.b32.xlu0 %v1614_v22, %s1119_s3 }
 0x29c   :  { %v662_v10 = vpop.permute.xlu1 %661 }
 0x29d   :  { %v682_v14 = vadd.f32 %v1023_v4, %v662_v10 }
 0x2a2   :  { %600 = vrot.lane.b32.xlu1 %v1532_v38, %s1119_s3 }
 0x2a3   :  { %903 = vrot.lane.b32.xlu0 %v1696_v7, %s1108_s0 }
 0x2a4   :  { %v660_v45 = vpop.permute.xlu0 %659  ;;  %v915_v38 = vpop.permute.xlu1 %914 }
 0x2a5   :  { %v666_v23 = vsel %vm118_vm0, %v660_v45, %v662_v10  ;;  %v1711_v54 = vsel %vm926_vm15, %v915_v38, %v917_v53  ;;  %v1739_v53 = vld [vmem:[#allocation3] sm:$0xff] }
 0x2a6   :  { %v681_v47 = vadd.f32 %v1020_v19, %v666_v23 }
 0x2a8   :  { %v718_v48 = vadd.f32 %v703_v33, %v681_v47  ;;  %v505_v47 = vadd.f32 %v1619_v44, %v1574_v46 }
 0x2aa   :  { %v763_v22 = vrot.slane %v718_v48, 1  ;;  %629 = vrot.lane.b32.xlu1 %v1572_v11, %s1119_s3 }
 0x2ac   :  { %v1706_v12 = vsel %vm182_vm3, %v758_v26, %v763_v22  ;;  %v613_v22 = vadd.f32 %v1680_v0, %v505_v47 }
 0x2b2   :  { %635 = vrot.lane.b32.xlu1 %v1587_v29, %s1119_s3 }
 0x2c3   :  { %v790_v51 = vpop.permute.xlu2 %789 }
 0x2cb   :  { %v1713_v17 = vpop.permute.xlu2 %922 }
 0x2d3   :  { %v603_v40 = vpop.permute.xlu2 %602 }
 0x2d4   :  { %v615_v50 = vadd.f32 %v603_v40, %v1582_v52 }
 0x2da   :  { %v792_v31 = vpop.permute.xlu0 %791 }
 0x2db   :  { %v798_v11 = vsel %vm118_vm0, %v790_v51, %v792_v31  ;;  %v809_v60 = vadd.f32 %v1018_v36, %v792_v31 }
 0x2dc   :  { %v808_v29 = vadd.f32 %v1717_v57, %v798_v11 }
 0x2dd   :  { %v1722_v28 = vadd.f32 %v819_v30, %v809_v60  ;;  %v719_v30 = vadd.f32 %v1668_v1, %v682_v14 }
 0x2de   :  { %v1724_v42 = vadd.f32 %v826_v20, %v808_v29 }
 0x2df   :  { %899 = vrot.lane.b32.xlu1 %v1722_v28, %s1108_s0  ;;  %v765_v21 = vrot.slane %v719_v30, 1  ;;  %v850_v26 = vrot.slane %v1722_v28, 6 }
 0x2e0   :  { %897 = vrot.lane.b32.xlu0 %v1724_v42, %s1108_s0  ;;  %v847_v36 = vrot.slane %v1724_v42, 6 }
 0x2e1   :  { %v766_v1 = vsel %vm182_vm3, %v761_v56, %v765_v21  ;;  %v1025_v56 = vld [vmem:[#allocation6] sm:$0xff]  ;;  %vm939_vm3 = vcmask 1040384  }
 0x2e8   :  { %v788_v52 = vpop.permute.xlu1 %787  ;;  %738 = vrot.lane.b32.xlu0 %v1656_v13, %s1120_s4  ;;  %v825_v13 = vsel %vm824_vm1, %v1546_v24, %v1593_v61 }
 0x2e9   :  { %v807_v9 = vadd.f32 %v1022_v49, %v788_v52 }
 0x2eb   :  { %v1733_v55 = vadd.f32 %v1593_v61, %v807_v9 }
 0x2ed   :  { %895 = vrot.lane.b32.xlu2 %v1733_v55, %s1108_s0  ;;  %v786_v15 = vpop.permute.xlu0 %785  ;;  %v849_v46 = vrot.slane %v1733_v55, 6 }
 0x2ee   :  { %v797_v6 = vsel %vm118_vm0, %v786_v15, %v788_v52 }
 0x2ef   :  { %v806_v33 = vadd.f32 %v1739_v53, %v797_v6 }
 0x2f0   :  { %767 = vrot.lane.b32.xlu0 %v759_v5, %s1120_s4 }
 0x2f1   :  { %v834_v63 = vadd.f32 %v825_v13, %v806_v33 }
 0x2f3   :  { %893 = vrot.lane.b32.xlu1 %v834_v63, %s1108_s0  ;;  %v846_v23 = vrot.slane %v834_v63, 6 }
 0x2f5   :  { %v1747_v62 = vpop.permute.xlu0 %918  ;;  %v848_v48 = vsel %vm81_vm8, %v846_v23, %v847_v36 }
 0x2f8   :  { %773 = vrot.lane.b32.xlu0 %v766_v1, %s1120_s4 }
 0x2fb   :  { %740 = vrot.lane.b32.xlu1 %v733_v25, %s1120_s4 }
 0x2fd   :  { %v1754_v8 = vpop.permute.xlu0 %924 }
 0x300   :  { %877 = vrot.lane.b32.xlu0 %v1722_v28, %s1121_s5 }
 0x303   :  { %769 = vrot.lane.b32.xlu1 %v1638_v3, %s1120_s4  ;;  %v854_v3 = vrot.slane %v1696_v7, 6 }
 0x304   :  { %v794_v24 = vpop.permute.xlu1 %793 }
 0x305   :  { %v799_v61 = vsel %vm118_vm0, %v794_v24, %v1687_v2  ;;  %v605_v39 = vpop.permute.xlu0 %604  ;;  %v855_v2 = vsel %vm81_vm8, %v850_v26, %v854_v3 }
 0x306   :  { %v810_v37 = vadd.f32 %v1025_v56, %v799_v61  ;;  %v608_v41 = vsel %vm606_vm2, %v603_v40, %v605_v39 }
 0x307   :  { %v616_v5 = vadd.f32 %v608_v41, %v1589_v34 }
 0x308   :  { %v838_v25 = vadd.f32 %v827_v27, %v810_v37 }
 0x30a   :  { %901 = vrot.lane.b32.xlu2 %v838_v25, %s1108_s0  ;;  %v852_v16 = vrot.slane %v838_v25, 6 }
 0x30b   :  { %862 = vrot.lane.b32.xlu1 %v855_v2, %s1121_s5 }
 0x30c   :  { %v921_v58 = vpop.permute.xlu1 %920  ;;  %v853_v10 = vsel %vm81_vm8, %v847_v36, %v852_v16 }
 0x30d   :  { %860 = vrot.lane.b32.xlu0 %v853_v10, %s1121_s5  ;;  %v634_v35 = vpop.permute.xlu0 %633  ;;  %v928_v52 = vsel %vm926_vm15, %v1747_v62, %v921_v58 }
 0x30e   :  { %v1775_v43 = vadd.f32 %v634_v35, %v615_v50 }
 0x312   :  { %736 = vrot.lane.b32.xlu2 %v1662_v32, %s1120_s4  ;;  %v632_v32 = vpop.permute.xlu2 %631 }
 0x313   :  { %879 = vrot.lane.b32.xlu1 %v838_v25, %s1121_s5 }
 0x314   :  { %v601_v34 = vpop.permute.xlu1 %600 }
 0x315   :  { %v607_v45 = vsel %vm606_vm2, %v1680_v0, %v601_v34  ;;  %v851_v0 = vsel %vm81_vm8, %v849_v46, %v850_v26  ;;  %v904_v31 = vpop.permute.xlu0 %903 }
 0x316   :  { %v614_v19 = vadd.f32 %v607_v45, %v1622_v59 }
 0x31a   :  { %742 = vrot.lane.b32.xlu2 %v1641_v18, %s1120_s4 }
 0x31b   :  { %856 = vrot.lane.b32.xlu1 %v848_v48, %s1121_s5 }
 0x31c   :  { %v630_v38 = vpop.permute.xlu1 %629 }
 0x31d   :  { %v637_v51 = vsel %vm606_vm2, %v630_v38, %v632_v32  ;;  %v643_v40 = vadd.f32 %v630_v38, %v613_v22 }
 0x31e   :  { %v644_v50 = vadd.f32 %v637_v51, %v614_v19 }
 0x322   :  { %771 = vrot.lane.b32.xlu2 %v1706_v12, %s1120_s4 }
 0x324   :  { %v636_v59 = vpop.permute.xlu1 %635 }
 0x325   :  { %v638_v44 = vsel %vm606_vm2, %v634_v35, %v636_v59 }
 0x326   :  { %v1795_v18 = vadd.f32 %v638_v44, %v616_v5 }
 0x32a   :  { %858 = vrot.lane.b32.xlu2 %v851_v0, %s1121_s5 }
 0x332   :  { %875 = vrot.lane.b32.xlu2 %v1724_v42, %s1121_s5 }
 0x33a   :  { %881 = vrot.lane.b32.xlu2 %v1696_v7, %s1121_s5  ;;  %v929_v7 = vsel %vm926_vm15, %v1713_v17, %v1754_v8 }
 0x347   :  { %v896_v11 = vpop.permute.xlu2 %895 }
 0x351   :  { %v900_v12 = vpop.permute.xlu1 %899 }
 0x352   :  { %v898_v60 = vpop.permute.xlu0 %897 }
 0x353   :  { %v906_v29 = vsel %vm118_vm0, %v898_v60, %v900_v12 }
 0x354   :  { %v912_v20 = vadd.f32 %v1717_v57, %v906_v29 }
 0x356   :  { %v934_v4 = vadd.f32 %v928_v52, %v912_v20 }
 0x358   :  { %v941_v6 = vrot.slane %v934_v4, 7 }
 0x35a   :  { %v739_v1 = vpop.permute.xlu0 %738 }
 0x362   :  { %v768_v17 = vpop.permute.xlu0 %767 }
 0x364   :  { %v902_v28 = vpop.permute.xlu2 %901 }
 0x365   :  { %v907_v49 = vsel %vm118_vm0, %v902_v28, %v904_v31  ;;  %v894_v9 = vpop.permute.xlu1 %893 }
 0x366   :  { %v913_v42 = vadd.f32 %v1025_v56, %v907_v49  ;;  %v905_v14 = vsel %vm118_vm0, %v894_v9, %v896_v11  ;;  %vm744_vm0 = vcmask 39936  }
 0x367   :  { %v911_v55 = vadd.f32 %v1739_v53, %v905_v14 }
 0x368   :  { %v935_v15 = vadd.f32 %v929_v7, %v913_v42 }
 0x369   :  { %v933_v57 = vadd.f32 %v1711_v54, %v911_v55 }
 0x36a   :  { %v943_v30 = vrot.slane %v935_v15, 7  ;;  %v774_v39 = vpop.permute.xlu0 %773 }
 0x36b   :  { %v940_v33 = vrot.slane %v933_v57, 7 }
 0x36c   :  { %v944_v13 = vsel %vm939_vm3, %v941_v6, %v943_v30  ;;  %v737_v62 = vpop.permute.xlu2 %736 }
 0x36d   :  { %947 = vrot.lane.b32.xlu1 %v944_v13, %s1122_s6  ;;  %v942_v63 = vsel %vm939_vm3, %v940_v33, %v941_v6  ;;  %v741_v21 = vpop.permute.xlu1 %740  ;;  %v745_v41 = vsel %vm744_vm0, %v737_v62, %v739_v1  ;;  %v751_v26 = vadd.f32 %v737_v62, %v643_v40 }
 0x36e   :  { %945 = vrot.lane.b32.xlu0 %v942_v63, %s1122_s6  ;;  %v753_v5 = vadd.f32 %v741_v21, %v1775_v43  ;;  %v752_v3 = vadd.f32 %v745_v41, %v644_v50 }
 0x36f   :  { %v781_v35 = vadd.f32 %v768_v17, %v751_v26 }
 0x372   :  { %v878_v37 = vpop.permute.xlu0 %877 }
 0x374   :  { %v743_v61 = vpop.permute.xlu2 %742 }
 0x375   :  { %v770_v24 = vpop.permute.xlu1 %769  ;;  %v746_v23 = vsel %vm744_vm0, %v741_v21, %v743_v61 }
 0x376   :  { %v775_v25 = vsel %vm744_vm0, %v768_v17, %v770_v24  ;;  %v754_v22 = vadd.f32 %v746_v23, %v1795_v18 }
 0x377   :  { %v782_v10 = vadd.f32 %v775_v25, %v752_v3 }
 0x37c   :  { %v772_v53 = vpop.permute.xlu2 %771 }
 0x37d   :  { %v863_v8 = vpop.permute.xlu1 %862  ;;  %v783_v36 = vadd.f32 %v772_v53, %v753_v5  ;;  %v776_v47 = vsel %vm744_vm0, %v772_v53, %v774_v39 }
 0x37e   :  { %v784_v59 = vadd.f32 %v776_v47, %v754_v22 }
 0x37f   :  { %v861_v16 = vpop.permute.xlu0 %860 }
 0x380   :  { %v873_v19 = vadd.f32 %v861_v16, %v783_v36  ;;  %v866_v31 = vsel %vm864_vm4, %v861_v16, %v863_v8 }
 0x381   :  { %v874_v12 = vadd.f32 %v866_v31, %v784_v59 }
 0x384   :  { %v859_v54 = vpop.permute.xlu2 %858 }
 0x385   :  { %v880_v56 = vpop.permute.xlu1 %879 }
 0x386   :  { %v891_v48 = vadd.f32 %v880_v56, %v873_v19 }
 0x38c   :  { %v876_v2 = vpop.permute.xlu2 %875 }
 0x38d   :  { %v857_v27 = vpop.permute.xlu1 %856  ;;  %v883_v43 = vsel %vm864_vm4, %v876_v2, %v878_v37 }
 0x38e   :  { %v865_v58 = vsel %vm864_vm4, %v857_v27, %v859_v54  ;;  %v871_v34 = vadd.f32 %v857_v27, %v781_v35 }
 0x38f   :  { %v872_v45 = vadd.f32 %v865_v58, %v782_v10 }
 0x390   :  { %v889_v51 = vadd.f32 %v876_v2, %v871_v34 }
 0x391   :  { %v890_v38 = vadd.f32 %v883_v43, %v872_v45 }
 0x394   :  { %v882_v46 = vpop.permute.xlu2 %881 }
 0x395   :  { %v884_v11 = vsel %vm864_vm4, %v880_v56, %v882_v46 }
 0x396   :  { %v892_v60 = vadd.f32 %v884_v11, %v874_v12 }
 0x3df   :  { %v948_v32 = vpop.permute.xlu1 %947 }
 0x3e0   :  { %v953_v40 = vadd.f32 %v948_v32, %v891_v48  ;;  %v946_v50 = vpop.permute.xlu0 %945  ;;  %v954_v18 = vadd.f32 %v948_v32, %v892_v60 }
 0x3e1   :  { %v951_v44 = vadd.f32 %v946_v50, %v889_v51  ;;  %v952_v0 = vadd.f32 %v946_v50, %v890_v38 }
 0x3e2   :  { %963 = vrot.lane.b32.xlu1 %v953_v40, %s1123_s7 }
 0x3e3   :  { %961 = vrot.lane.b32.xlu0 %v952_v0, %s1123_s7  ;;  %959 = vrot.lane.b32.xlu2 %v951_v44, %s1123_s7 }
 0x3eb   :  { %965 = vrot.lane.b32.xlu2 %v954_v18, %s1123_s7 }
 0x43d   :  { %v960_v29 = vpop.permute.xlu2 %959 }
 0x445   :  { %v966_v20 = vpop.permute.xlu2 %965 }
 0x454   :  { %v964_v28 = vpop.permute.xlu1 %963 }
 0x455   :  { %v969_v52 = vsel %vm967_vm5, %v964_v28, %v966_v20  ;;  %v962_v49 = vpop.permute.xlu0 %961 }
 0x456   :  { %973 = vst [vmem:[#allocation8 + $0x8] sm:$0xff] %v969_v52  ;;  %v968_v9 = vsel %vm967_vm5, %v960_v29, %v962_v49 }
 0x457   :  { %972 = vst [vmem:[#allocation8] sm:$0xff] %v968_v9 }
 0x458   :  { %986 = dma.vmem_to_hbm [thread:$0]  %s979_s9, 256, %s981_s12, [#allocation5], %s1125_s13, %s1125_s13, %s1126_s14  }
 0x459   :  { %1102 = dma.done.wait [#allocation5], 256  }
 0x45a   :  { %1103 = vsyncadd [#allocation5], 4294967040 }
 0x45b   :  { %991 = vsyncpa [#allocation4], 1 }
 0x45c   :  { %992 = vsyncpa [#allocation7], 1 }
 0x45d   :  { %993 = vsyncpa [#allocation5], 1 }

</bundles_post_ra>
